<compile_context>
chip_gen: v7x
topology: tpu7x:2x2x1
jax: 0.10.0
libtpu: 0.0.40
codegen_flags: <defaults>
</compile_context>

<pallas_src>
import functools

import jax
import jax.numpy as jnp
from jax.experimental import pallas as pl
from jax.experimental.pallas import tpu as pltpu

_LANE = 128      # lane width (last dim)
_SUBLANE = 8     # sublane width (second-to-last dim)


def _round_up(n, m):
    return (n + m - 1) // m * m


def _cdiv(a, b):
    return (a + b - 1) // b


def _vmem_capacity_bytes():
    """Per-core VMEM capacity; conservative 64 MiB (v7x) if undetectable."""
    try:
        cap = int(pltpu.get_tpu_info().vmem_capacity_bytes)
        if cap > 0:
            return cap
    except Exception:
        pass
    return 64 * 1024 * 1024


def _num_tensorcores():
    """TensorCores per chip (megacore); 1 if undetectable."""
    try:
        info = pltpu.get_tpu_info()
        for name in ("num_cores", "core_count", "num_tensorcores",
                     "tensorcore_count"):
            v = getattr(info, name, None)
            if isinstance(v, int) and v > 0:
                return v
    except Exception:
        pass
    try:
        v = getattr(jax.devices()[0], "num_cores", None)
        if isinstance(v, int) and v > 0:
            return v
    except Exception:
        pass
    return 1


def _mlp_kernel(x_ref, *refs, num_layers):
    """h = x; per layer: h = h @ W + b (bf16 MXU matmul, f32 accum); tanh on
    all but the last layer.  Every feature dim is padded to a 128-lane
    multiple so each dot / store is lane-dense (unmasked vst)."""
    o_ref = refs[-1]
    wb = refs[:-1]
    h = x_ref[...]                                        # f32 [tile_b, in_p]
    for i in range(num_layers):
        w = wb[2 * i][...]                                # bf16 [k_p, n_p]
        b = wb[2 * i + 1][...]                            # f32  [1, n_p]
        h = jnp.dot(h.astype(jnp.bfloat16), w,
                    preferred_element_type=jnp.float32) + b
        if i < num_layers - 1:
            h = jnp.tanh(h)                               # EUP, f32 (v5e-safe)
    o_ref[...] = h.astype(o_ref.dtype)


def make_net_forward(params, *, batch_tile=512, weight_buffers=1):
    """Build a jitted `forward(x)` for the given (unpadded) params.

    params: list of (w [in, out], b [out]); w is PyTorch weight.T so the
            kernel computes x @ w + b.
    """
    num_layers = len(params)
    in_dim = params[0][0].shape[0]
    out_dim = params[-1][0].shape[1]
    in_p = _round_up(in_dim, _LANE)
    out_p = _round_up(out_dim, _LANE)

    # ---- pad + cast weights ONCE (zero padding keeps padded lanes at 0) ----
    padded = []
    dims_p = []
    for (w, b) in params:
        k, n = w.shape
        k_p, n_p = _round_up(k, _LANE), _round_up(n, _LANE)
        w_p = (jnp.zeros((k_p, n_p), jnp.float32)
               .at[:k, :n].set(w.astype(jnp.float32))
               .astype(jnp.bfloat16))
        b_p = jnp.zeros((1, n_p), jnp.float32).at[0, :n].set(
            b.astype(jnp.float32))
        padded += [w_p, b_p]
        dims_p.append((k_p, n_p))
    padded = tuple(padded)
    max_dim_p = max([in_p] + [n_p for _, n_p in dims_p])

    # ---- VMEM budgeting -----------------------------------------------------
    wbufs = weight_buffers if weight_buffers else 2
    weight_bytes = sum(k_p * n_p * 2 + n_p * 4 for k_p, n_p in dims_p) * wbufs
    # Per batch row: double-buffered streamed x & out tiles + live f32 h work.
    row_bytes = 4 * in_p * 2 + 4 * out_p * 2 + 4 * max_dim_p * 3
    capacity = _vmem_capacity_bytes()
    budget = int(capacity * 0.75)
    tile_cap = max(_SUBLANE,
                   ((budget - weight_bytes) // max(row_bytes, 1))
                   // _SUBLANE * _SUBLANE)
    # TODO(synk): if the bf16 weight stack alone exceeds the per-core VMEM
    # budget (wide nets on v7x), stream weights over a second "arbitrary"
    # grid axis instead of keeping them resident; not needed at these sizes.
    batch_tile = max(_SUBLANE, min(batch_tile, tile_cap))
    num_cores = _num_tensorcores()

    def forward(x):
        batch = x.shape[0]
        # Balanced tiling: at least one tile per TensorCore (megacore), at
        # most ceil(batch / batch_tile) tiles, >= 8 rows per tile.
        n_tiles = max(_cdiv(batch, batch_tile),
                      min(num_cores, max(_cdiv(batch, _SUBLANE), 1)))
        tile_b = _round_up(_cdiv(batch, n_tiles), _SUBLANE)
        batch_p = tile_b * n_tiles

        x_p = jnp.zeros((batch_p, in_p), jnp.float32)
        x_p = x_p.at[:batch, :in_dim].set(x.astype(jnp.float32))

        # Weight/bias index maps are constant -> DMA'd once, VMEM-resident;
        # single-buffer them when supported (no useless second copy).
        wb_kwargs = {}
        if weight_buffers and hasattr(pl, "Buffered"):
            wb_kwargs = dict(pipeline_mode=pl.Buffered(weight_buffers))

        in_specs = [pl.BlockSpec((tile_b, in_p), lambda i: (i, 0))]
        for k_p, n_p in dims_p:
            in_specs.append(
                pl.BlockSpec((k_p, n_p), lambda i: (0, 0), **wb_kwargs))
            in_specs.append(
                pl.BlockSpec((1, n_p), lambda i: (0, 0), **wb_kwargs))

        vmem_need = weight_bytes + tile_b * row_bytes
        vmem_limit = max(32 * 1024 * 1024,
                         int(vmem_need * 1.25) + (2 << 20))
        vmem_limit = min(vmem_limit, capacity)

        kernel = functools.partial(_mlp_kernel, num_layers=num_layers)
        y_p = pl.pallas_call(
            kernel,
            out_shape=jax.ShapeDtypeStruct((batch_p, out_p), jnp.float32),
            grid=(n_tiles,),
            in_specs=in_specs,
            out_specs=pl.BlockSpec((tile_b, out_p), lambda i: (i, 0)),
            compiler_params=pltpu.CompilerParams(
                dimension_semantics=("parallel",),
                vmem_limit_bytes=vmem_limit),
        )(x_p, *padded)

        # Slice padded batch rows / output lanes back to the true shape.
        # (torch.cat((empty, x)) in the original forward is the identity.)
        return y_p[:batch, :out_dim]

    return jax.jit(forward)


def init_params(key, dims):
    """Deterministic init mirroring nn.Linear default (uniform ±1/sqrt(fan_in)).

    Weights stored as [in, out] (= PyTorch weight.T), bias as [out].
    """
    params = []
    for i in range(len(dims) - 1):
        key, kw, kb = jax.random.split(key, 3)
        fan_in, fan_out = dims[i], dims[i + 1]
        bound = 1.0 / jnp.sqrt(jnp.float32(fan_in))
        w = jax.random.uniform(kw, (fan_in, fan_out), jnp.float32, -bound, bound)
        b = jax.random.uniform(kb, (fan_out,), jnp.float32, -bound, bound)
        params.append((w, b))
    return params


if __name__ == "__main__":
    dims = [32, 64, 48, 16]   # nhid = 4 -> 3 linear layers, 2 with tanh
    batch = 8

    key = jax.random.PRNGKey(0)
    key, kx = jax.random.split(key)
    x = jax.random.normal(kx, (batch, dims[0]), dtype=jnp.float32)

    params = init_params(key, dims)

    forward = make_net_forward(params)
    try:
        out = jax.block_until_ready(forward(x))
    except Exception:
        # Fallback: some runtimes reject single-buffered (Buffered(1)) specs.
        forward = make_net_forward(params, weight_buffers=None)
        out = jax.block_until_ready(forward(x))

    assert out.shape == (batch, dims[-1]), out.shape

    # Reference check in plain JAX f32.  The kernel's bf16 MXU matmuls (f32
    # accumulation) agree with the f32/f64 reference to ~1e-2 relative, which
    # these tolerances absorb.
    ref = x
    for i, (w, b) in enumerate(params):
        ref = ref @ w + b[None, :]
        if i < len(params) - 1:
            ref = jnp.tanh(ref)
    assert jnp.allclose(out, ref, atol=5e-2, rtol=5e-2), (
        float(jnp.max(jnp.abs(out - ref))))

    print("KERNEL_OK")
</pallas_src>

<mosaic_0001>
module attributes {stable_mosaic.version = 11 : i64} {
  func.func @_mlp_kernel(%arg0: i32, %arg1: memref<8x128xf32, #tpu.memory_space<vmem>>, %arg2: memref<128x128xbf16, #tpu.memory_space<vmem>>, %arg3: memref<1x128xf32, #tpu.memory_space<vmem>>, %arg4: memref<128x128xbf16, #tpu.memory_space<vmem>>, %arg5: memref<1x128xf32, #tpu.memory_space<vmem>>, %arg6: memref<128x128xbf16, #tpu.memory_space<vmem>>, %arg7: memref<1x128xf32, #tpu.memory_space<vmem>>, %arg8: memref<8x128xf32, #tpu.memory_space<vmem>>) attributes {dimension_semantics = [#tpu.dimension_semantics<parallel>], iteration_bounds = array<i64: 1>, scalar_prefetch = 0 : i64, scratch_operands = 0 : i64, tpu.core_type = #tpu.core_type<tc>, window_params = [{transform_indices = @transform_0, window_bounds = array<i64: 8, 128>}, {pipeline_mode = #tpu.pipeline_mode<synchronous>, transform_indices = @transform_1, window_bounds = array<i64: 128, 128>}, {pipeline_mode = #tpu.pipeline_mode<synchronous>, transform_indices = @transform_2, window_bounds = array<i64: 1, 128>}, {pipeline_mode = #tpu.pipeline_mode<synchronous>, transform_indices = @transform_3, window_bounds = array<i64: 128, 128>}, {pipeline_mode = #tpu.pipeline_mode<synchronous>, transform_indices = @transform_4, window_bounds = array<i64: 1, 128>}, {pipeline_mode = #tpu.pipeline_mode<synchronous>, transform_indices = @transform_5, window_bounds = array<i64: 128, 128>}, {pipeline_mode = #tpu.pipeline_mode<synchronous>, transform_indices = @transform_6, window_bounds = array<i64: 1, 128>}, {transform_indices = @transform_7, window_bounds = array<i64: 8, 128>}]} {
    %c0 = arith.constant 0 : index
    %c0_0 = arith.constant 0 : index
    %0 = vector.load %arg1[%c0, %c0_0] : memref<8x128xf32, #tpu.memory_space<vmem>>, vector<8x128xf32>
    %c0_1 = arith.constant 0 : index
    %c0_2 = arith.constant 0 : index
    %1 = vector.load %arg2[%c0_1, %c0_2] : memref<128x128xbf16, #tpu.memory_space<vmem>>, vector<128x128xbf16>
    %c0_3 = arith.constant 0 : index
    %c0_4 = arith.constant 0 : index
    %2 = vector.load %arg3[%c0_3, %c0_4] : memref<1x128xf32, #tpu.memory_space<vmem>>, vector<1x128xf32>
    %3 = arith.truncf %0 : vector<8x128xf32> to vector<8x128xbf16>
    %cst = arith.constant dense<0.000000e+00> : vector<8x128xf32>
    %4 = tpu.matmul %3, %1, %cst {dimension_numbers = #tpu.dot_dimension_numbers<[1], [0], [0], [1], [0, 0, 1, 1], [], []>} : vector<8x128xbf16>, vector<128x128xbf16>, vector<8x128xf32> -> vector<8x128xf32>
    %5 = vector.broadcast %2 : vector<1x128xf32> to vector<8x128xf32>
    %6 = arith.addf %4, %5 : vector<8x128xf32>
    %7 = math.tanh %6 : vector<8x128xf32>
    %c0_5 = arith.constant 0 : index
    %c0_6 = arith.constant 0 : index
    %8 = vector.load %arg4[%c0_5, %c0_6] : memref<128x128xbf16, #tpu.memory_space<vmem>>, vector<128x128xbf16>
    %c0_7 = arith.constant 0 : index
    %c0_8 = arith.constant 0 : index
    %9 = vector.load %arg5[%c0_7, %c0_8] : memref<1x128xf32, #tpu.memory_space<vmem>>, vector<1x128xf32>
    %10 = arith.truncf %7 : vector<8x128xf32> to vector<8x128xbf16>
    %cst_9 = arith.constant dense<0.000000e+00> : vector<8x128xf32>
    %11 = tpu.matmul %10, %8, %cst_9 {dimension_numbers = #tpu.dot_dimension_numbers<[1], [0], [0], [1], [0, 0, 1, 1], [], []>} : vector<8x128xbf16>, vector<128x128xbf16>, vector<8x128xf32> -> vector<8x128xf32>
    %12 = vector.broadcast %9 : vector<1x128xf32> to vector<8x128xf32>
    %13 = arith.addf %11, %12 : vector<8x128xf32>
    %14 = math.tanh %13 : vector<8x128xf32>
    %c0_10 = arith.constant 0 : index
    %c0_11 = arith.constant 0 : index
    %15 = vector.load %arg6[%c0_10, %c0_11] : memref<128x128xbf16, #tpu.memory_space<vmem>>, vector<128x128xbf16>
    %c0_12 = arith.constant 0 : index
    %c0_13 = arith.constant 0 : index
    %16 = vector.load %arg7[%c0_12, %c0_13] : memref<1x128xf32, #tpu.memory_space<vmem>>, vector<1x128xf32>
    %17 = arith.truncf %14 : vector<8x128xf32> to vector<8x128xbf16>
    %cst_14 = arith.constant dense<0.000000e+00> : vector<8x128xf32>
    %18 = tpu.matmul %17, %15, %cst_14 {dimension_numbers = #tpu.dot_dimension_numbers<[1], [0], [0], [1], [0, 0, 1, 1], [], []>} : vector<8x128xbf16>, vector<128x128xbf16>, vector<8x128xf32> -> vector<8x128xf32>
    %19 = vector.broadcast %16 : vector<1x128xf32> to vector<8x128xf32>
    %20 = arith.addf %18, %19 : vector<8x128xf32>
    %c0_15 = arith.constant 0 : index
    %c0_16 = arith.constant 0 : index
    %21 = vector.load %arg8[%c0_15, %c0_16] : memref<8x128xf32, #tpu.memory_space<vmem>>, vector<8x128xf32>
    tpu.vector_store %arg8[%c0_15, %c0_16], %20 {strides = array<i32>} : memref<8x128xf32, #tpu.memory_space<vmem>>, vector<8x128xf32>,
    return
  }
  func.func @transform_0(%arg0: i32) -> (i32, i32) {
    %c0_i32 = arith.constant 0 : i32
    %c0_i32_0 = arith.constant 0 : i32
    return %arg0, %c0_i32 : i32, i32
  }
  func.func @transform_1(%arg0: i32) -> (i32, i32) {
    %c0_i32 = arith.constant 0 : i32
    %c0_i32_0 = arith.constant 0 : i32
    %c0_i32_1 = arith.constant 0 : i32
    return %c0_i32, %c0_i32_0 : i32, i32
  }
  func.func @transform_2(%arg0: i32) -> (i32, i32) {
    %c0_i32 = arith.constant 0 : i32
    %c0_i32_0 = arith.constant 0 : i32
    %c0_i32_1 = arith.constant 0 : i32
    return %c0_i32, %c0_i32_0 : i32, i32
  }
  func.func @transform_3(%arg0: i32) -> (i32, i32) {
    %c0_i32 = arith.constant 0 : i32
    %c0_i32_0 = arith.constant 0 : i32
    %c0_i32_1 = arith.constant 0 : i32
    return %c0_i32, %c0_i32_0 : i32, i32
  }
  func.func @transform_4(%arg0: i32) -> (i32, i32) {
    %c0_i32 = arith.constant 0 : i32
    %c0_i32_0 = arith.constant 0 : i32
    %c0_i32_1 = arith.constant 0 : i32
    return %c0_i32, %c0_i32_0 : i32, i32
  }
  func.func @transform_5(%arg0: i32) -> (i32, i32) {
    %c0_i32 = arith.constant 0 : i32
    %c0_i32_0 = arith.constant 0 : i32
    %c0_i32_1 = arith.constant 0 : i32
    return %c0_i32, %c0_i32_0 : i32, i32
  }
  func.func @transform_6(%arg0: i32) -> (i32, i32) {
    %c0_i32 = arith.constant 0 : i32
    %c0_i32_0 = arith.constant 0 : i32
    %c0_i32_1 = arith.constant 0 : i32
    return %c0_i32, %c0_i32_0 : i32, i32
  }
  func.func @transform_7(%arg0: i32) -> (i32, i32) {
    %c0_i32 = arith.constant 0 : i32
    %c0_i32_0 = arith.constant 0 : i32
    return %arg0, %c0_i32 : i32, i32
  }
}

module attributes {stable_mosaic.version = 11 : i64} {
  func.func @_mlp_kernel(%arg0: i32, %arg1: memref<8x128xf32, #tpu.memory_space<vmem>>, %arg2: memref<128x128xbf16, #tpu.memory_space<vmem>>, %arg3: memref<1x128xf32, #tpu.memory_space<vmem>>, %arg4: memref<128x128xbf16, #tpu.memory_space<vmem>>, %arg5: memref<1x128xf32, #tpu.memory_space<vmem>>, %arg6: memref<128x128xbf16, #tpu.memory_space<vmem>>, %arg7: memref<1x128xf32, #tpu.memory_space<vmem>>, %arg8: memref<8x128xf32, #tpu.memory_space<vmem>>) attributes {dimension_semantics = [#tpu.dimension_semantics<parallel>], iteration_bounds = array<i64: 1>, scalar_prefetch = 0 : i64, scratch_operands = 0 : i64, tpu.core_type = #tpu.core_type<tc>, window_params = [{transform_indices = @transform_0, window_bounds = array<i64: 8, 128>}, {pipeline_mode = #tpu.pipeline_mode<synchronous>, transform_indices = @transform_1, window_bounds = array<i64: 128, 128>}, {pipeline_mode = #tpu.pipeline_mode<synchronous>, transform_indices = @transform_2, window_bounds = array<i64: 1, 128>}, {pipeline_mode = #tpu.pipeline_mode<synchronous>, transform_indices = @transform_3, window_bounds = array<i64: 128, 128>}, {pipeline_mode = #tpu.pipeline_mode<synchronous>, transform_indices = @transform_4, window_bounds = array<i64: 1, 128>}, {pipeline_mode = #tpu.pipeline_mode<synchronous>, transform_indices = @transform_5, window_bounds = array<i64: 128, 128>}, {pipeline_mode = #tpu.pipeline_mode<synchronous>, transform_indices = @transform_6, window_bounds = array<i64: 1, 128>}, {transform_indices = @transform_7, window_bounds = array<i64: 8, 128>}]} {
    %c0 = arith.constant 0 : index
    %c0_0 = arith.constant 0 : index
    %0 = vector.load %arg1[%c0, %c0_0] : memref<8x128xf32, #tpu.memory_space<vmem>>, vector<8x128xf32>
    %c0_1 = arith.constant 0 : index
    %c0_2 = arith.constant 0 : index
    %1 = vector.load %arg2[%c0_1, %c0_2] : memref<128x128xbf16, #tpu.memory_space<vmem>>, vector<128x128xbf16>
    %c0_3 = arith.constant 0 : index
    %c0_4 = arith.constant 0 : index
    %2 = vector.load %arg3[%c0_3, %c0_4] : memref<1x128xf32, #tpu.memory_space<vmem>>, vector<1x128xf32>
    %3 = arith.truncf %0 : vector<8x128xf32> to vector<8x128xbf16>
    %cst = arith.constant dense<0.000000e+00> : vector<8x128xf32>
    %4 = tpu.matmul %3, %1, %cst {dimension_numbers = #tpu.dot_dimension_numbers<[1], [0], [0], [1], [0, 0, 1, 1], [], []>} : vector<8x128xbf16>, vector<128x128xbf16>, vector<8x128xf32> -> vector<8x128xf32>
    %5 = vector.broadcast %2 : vector<1x128xf32> to vector<8x128xf32>
    %6 = arith.addf %4, %5 : vector<8x128xf32>
    %7 = math.tanh %6 : vector<8x128xf32>
    %c0_5 = arith.constant 0 : index
    %c0_6 = arith.constant 0 : index
    %8 = vector.load %arg4[%c0_5, %c0_6] : memref<128x128xbf16, #tpu.memory_space<vmem>>, vector<128x128xbf16>
    %c0_7 = arith.constant 0 : index
    %c0_8 = arith.constant 0 : index
    %9 = vector.load %arg5[%c0_7, %c0_8] : memref<1x128xf32, #tpu.memory_space<vmem>>, vector<1x128xf32>
    %10 = arith.truncf %7 : vector<8x128xf32> to vector<8x128xbf16>
    %cst_9 = arith.constant dense<0.000000e+00> : vector<8x128xf32>
    %11 = tpu.matmul %10, %8, %cst_9 {dimension_numbers = #tpu.dot_dimension_numbers<[1], [0], [0], [1], [0, 0, 1, 1], [], []>} : vector<8x128xbf16>, vector<128x128xbf16>, vector<8x128xf32> -> vector<8x128xf32>
    %12 = vector.broadcast %9 : vector<1x128xf32> to vector<8x128xf32>
    %13 = arith.addf %11, %12 : vector<8x128xf32>
    %14 = math.tanh %13 : vector<8x128xf32>
    %c0_10 = arith.constant 0 : index
    %c0_11 = arith.constant 0 : index
    %15 = vector.load %arg6[%c0_10, %c0_11] : memref<128x128xbf16, #tpu.memory_space<vmem>>, vector<128x128xbf16>
    %c0_12 = arith.constant 0 : index
    %c0_13 = arith.constant 0 : index
    %16 = vector.load %arg7[%c0_12, %c0_13] : memref<1x128xf32, #tpu.memory_space<vmem>>, vector<1x128xf32>
    %17 = arith.truncf %14 : vector<8x128xf32> to vector<8x128xbf16>
    %cst_14 = arith.constant dense<0.000000e+00> : vector<8x128xf32>
    %18 = tpu.matmul %17, %15, %cst_14 {dimension_numbers = #tpu.dot_dimension_numbers<[1], [0], [0], [1], [0, 0, 1, 1], [], []>} : vector<8x128xbf16>, vector<128x128xbf16>, vector<8x128xf32> -> vector<8x128xf32>
    %19 = vector.broadcast %16 : vector<1x128xf32> to vector<8x128xf32>
    %20 = arith.addf %18, %19 : vector<8x128xf32>
    %c0_15 = arith.constant 0 : index
    %c0_16 = arith.constant 0 : index
    %21 = vector.load %arg8[%c0_15, %c0_16] : memref<8x128xf32, #tpu.memory_space<vmem>>, vector<8x128xf32>
    tpu.vector_store %arg8[%c0_15, %c0_16], %20 {strides = array<i32>} : memref<8x128xf32, #tpu.memory_space<vmem>>, vector<8x128xf32>,
    return
  }
  func.func @transform_0(%arg0: i32) -> (i32, i32) {
    %c0_i32 = arith.constant 0 : i32
    %c0_i32_0 = arith.constant 0 : i32
    return %arg0, %c0_i32 : i32, i32
  }
  func.func @transform_1(%arg0: i32) -> (i32, i32) {
    %c0_i32 = arith.constant 0 : i32
    %c0_i32_0 = arith.constant 0 : i32
    %c0_i32_1 = arith.constant 0 : i32
    return %c0_i32, %c0_i32_0 : i32, i32
  }
  func.func @transform_2(%arg0: i32) -> (i32, i32) {
    %c0_i32 = arith.constant 0 : i32
    %c0_i32_0 = arith.constant 0 : i32
    %c0_i32_1 = arith.constant 0 : i32
    return %c0_i32, %c0_i32_0 : i32, i32
  }
  func.func @transform_3(%arg0: i32) -> (i32, i32) {
    %c0_i32 = arith.constant 0 : i32
    %c0_i32_0 = arith.constant 0 : i32
    %c0_i32_1 = arith.constant 0 : i32
    return %c0_i32, %c0_i32_0 : i32, i32
  }
  func.func @transform_4(%arg0: i32) -> (i32, i32) {
    %c0_i32 = arith.constant 0 : i32
    %c0_i32_0 = arith.constant 0 : i32
    %c0_i32_1 = arith.constant 0 : i32
    return %c0_i32, %c0_i32_0 : i32, i32
  }
  func.func @transform_5(%arg0: i32) -> (i32, i32) {
    %c0_i32 = arith.constant 0 : i32
    %c0_i32_0 = arith.constant 0 : i32
    %c0_i32_1 = arith.constant 0 : i32
    return %c0_i32, %c0_i32_0 : i32, i32
  }
  func.func @transform_6(%arg0: i32) -> (i32, i32) {
    %c0_i32 = arith.constant 0 : i32
    %c0_i32_0 = arith.constant 0 : i32
    %c0_i32_1 = arith.constant 0 : i32
    return %c0_i32, %c0_i32_0 : i32, i32
  }
  func.func @transform_7(%arg0: i32) -> (i32, i32) {
    %c0_i32 = arith.constant 0 : i32
    %c0_i32_0 = arith.constant 0 : i32
    return %arg0, %c0_i32 : i32, i32
  }
}

</mosaic_0001>

<bundles_post_ra>
// kernel: forward.1
= control target key start
LH: loop header
LB: loop body
LE: loop exit
PB: predicated region body
PF: predicated region fallthrough
CT: control target
= control target key end

     0   :  { %12 = vsyncpa [#allocation3], 0  ;;  %s782_s0 = inlined_call_operand.vmem [shape: f32[8,128], index: 0, kind: input, shape index: {}]   ;;  %s783_s1 = inlined_call_operand.hbm [shape: bf16[128,128], index: 1, kind: input, shape index: {}]   ;;  %s784_s2 = inlined_call_operand.vmem [shape: f32[1,128], index: 2, kind: input, shape index: {}]   ;;  %s785_s3 = inlined_call_operand.hbm [shape: bf16[128,128], index: 3, kind: input, shape index: {}]   ;;  %s786_s4 = inlined_call_operand.vmem [shape: f32[1,128], index: 4, kind: input, shape index: {}]   ;;  %s787_s5 = inlined_call_operand.vmem [shape: bf16[128,128], index: 5, kind: input, shape index: {}]   ;;  %s788_s6 = inlined_call_operand.vmem [shape: f32[1,128], index: 6, kind: input, shape index: {}]   ;;  %s789_s7 = inlined_call_operand.hbm [shape: f32[8,128], index: 7, kind: output, shape index: {}]  }
   0x1   :  { %13 = vsyncpa [#allocation6], 0 }
   0x2   :  { %14 = vsyncpa [#allocation4], 0  ;;  %s633_s24 = smov [#allocation2]   ;;  %s561_s28 = scalar_lea.hbm %s783_s1, 1024 }
   0x3   :  { %s22_s25 = sshll.u32 %s633_s24, 4  ;;  %p562_p0 = scmp.ne.s32.totalorder %s783_s1, %s561_s28  ;;  %s23_s25 = int_to_ptr.vmem [resolvable:$true] %s22_s25 }
   0x4   :  { %p565_p1 = scmp.lt.u32.totalorder %s561_s28, %s783_s1 }
   0x6   :  { %p567_p2 = pnand %p565_p1, %p562_p0 }
   0x8   :  { %570 = shalt.err (!%p567_p2)
}
   0x9   :  { %s571_s10 = scalar_lea.vmem %s23_s25, 1024  ;;  %p576_p4 = scmp.lt.s32.totalorder %s23_s25, %s23_s25 }
   0xa   :  { %p572_p3 = scmp.ne.s32.totalorder %s23_s25, %s571_s10  ;;  %p577_p5 = scmp.lt.s32.totalorder %s571_s10, %s571_s10 }
   0xc   :  { %p578_p6 = por %p577_p5, %p576_p4 }
   0xe   :  { %p579_p7 = pnand %p578_p6, %p572_p3 }
  0x10   :  { %582 = shalt.err (!%p579_p7)
}
  0x11   :  { %s634_s11 = smov 64   ;;  %s635_s12 = smov 4  }
  0x12   :  { %28 = dma.hbm_to_vmem [thread:$0]  %s783_s1, 1024, %s23_s25, [#allocation3], %s634_s11, %s634_s11, %s635_s12  }
  0x13   :  { %s636_s15 = smov [#allocation5]   ;;  %s583_s19 = scalar_lea.hbm %s785_s3, 1024 }
  0x14   :  { %s36_s16 = sshll.u32 %s636_s15, 4  ;;  %p584_p8 = scmp.ne.s32.totalorder %s785_s3, %s583_s19  ;;  %s37_s16 = int_to_ptr.vmem [resolvable:$true] %s36_s16 }
  0x15   :  { %p587_p9 = scmp.lt.u32.totalorder %s583_s19, %s785_s3 }
  0x17   :  { %p589_p10 = pnand %p587_p9, %p584_p8 }
  0x19   :  { %592 = shalt.err (!%p589_p10)
}
  0x1a   :  { %s593_s24 = scalar_lea.vmem %s37_s16, 1024  ;;  %p598_p12 = scmp.lt.s32.totalorder %s37_s16, %s37_s16 }
  0x1b   :  { %p594_p11 = scmp.ne.s32.totalorder %s37_s16, %s593_s24  ;;  %p599_p13 = scmp.lt.s32.totalorder %s593_s24, %s593_s24 }
  0x1d   :  { %p600_p0 = por %p599_p13, %p598_p12 }
  0x1f   :  { %p601_p1 = pnand %p600_p0, %p594_p11 }
  0x21   :  { %604 = shalt.err (!%p601_p1)
}
  0x22   :  { %42 = dma.hbm_to_vmem [thread:$0]  %s785_s3, 1024, %s37_s16, [#allocation6], %s634_s11, %s634_s11, %s635_s12  }
  0x23   :  { %627 = dma.done.wait [#allocation3], 1024  }
  0x24   :  { %628 = vsyncadd [#allocation3], 4294966272 }
  0x25   :  { %629 = dma.done.wait [#allocation6], 1024  }
  0x26   :  { %630 = vsyncadd [#allocation6], 4294966272  ;;  %v637_v0 = vmov 0.0   ;;  %vm638_vm0 = vmmov 0   ;;  %v533_v1 = vld [vmem:[#allocation2] sm:$0xff]   ;;  %v534_v2 = vld [vmem:[#allocation2 + $0x8] sm:$0xff]  }
  0x27   :  { %466 = vmatprep.subr.bf16.mxu0 %v637_v0  ;;  %482 = vmatprep.mubr.msk.bf16.mxu0 %vm638_vm0, %v637_v0  ;;  %v535_v3 = vld [vmem:[#allocation2 + $0x10] sm:$0xff]   ;;  %v541_v4 = vld [vmem:[#allocation5] sm:$0xff]   ;;  %v536_v5 = vld [vmem:[#allocation2 + $0x18] sm:$0xff]   ;;  %s639_s24 = smov [#allocation7]  }
  0x28   :  { %486 = vmatprep.subr.bf16.mxu1 %v637_v0  ;;  %502 = vmatprep.mubr.msk.bf16.mxu1 %vm638_vm0, %v637_v0  ;;  %v542_v6 = vld [vmem:[#allocation5 + $0x8] sm:$0xff]   ;;  %v537_v7 = vld [vmem:[#allocation2 + $0x20] sm:$0xff]   ;;  %v543_v8 = vld [vmem:[#allocation5 + $0x10] sm:$0xff]  }
  0x29   :  { %467 = vmatpush3.bf16.msra.mxu0 %v533_v1  ;;  %487 = vmatpush3.bf16.msra.mxu1 %v541_v4  ;;  %v538_v9 = vld [vmem:[#allocation2 + $0x28] sm:$0xff]   ;;  %v544_v10 = vld [vmem:[#allocation5 + $0x18] sm:$0xff]   ;;  %v539_v11 = vld [vmem:[#allocation2 + $0x30] sm:$0xff]  }
  0x2a   :  { %468 = vmatprep.subr.bf16.mxu0 %v637_v0  ;;  %488 = vmatprep.subr.bf16.mxu1 %v637_v0  ;;  %v540_v12 = vld [vmem:[#allocation2 + $0x38] sm:$0xff]   ;;  %v56_v13 = vld [vmem:[%s782_s0] sm:$0xff]  ;;  %v546_v16 = vld [vmem:[#allocation5 + $0x28] sm:$0xff]  }
  0x2b   :  { %v74_v14 = vpack.c.bf16 %v56_v13, %v56_v13  ;;  %v545_v15 = vld [vmem:[#allocation5 + $0x20] sm:$0xff]   ;;  %v547_v17 = vld [vmem:[#allocation5 + $0x30] sm:$0xff]   ;;  %v548_v18 = vld [vmem:[#allocation5 + $0x38] sm:$0xff]  }
  0x2c   :  { %v549_v19 = vld [vmem:[%s787_s5] sm:$0xff]   ;;  %v550_v20 = vld [vmem:[%s787_s5 + $0x8] sm:$0xff]   ;;  %v551_v21 = vld [vmem:[%s787_s5 + $0x10] sm:$0xff]  }
  0x2d   :  { %469 = vmatpush3.bf16.msra.mxu0 %v534_v2  ;;  %489 = vmatpush3.bf16.msra.mxu1 %v542_v6  ;;  %v552_v22 = vld [vmem:[%s787_s5 + $0x18] sm:$0xff]   ;;  %v412_v23 = vld [vmem:[%s784_s2] ss:$0 sm:$0xff]  ;;  %v554_v32 = vld [vmem:[%s787_s5 + $0x28] sm:$0xff]  }
  0x2e   :  { %470 = vmatprep.subr.bf16.mxu0 %v637_v0  ;;  %490 = vmatprep.subr.bf16.mxu1 %v637_v0  ;;  %v553_v31 = vld [vmem:[%s787_s5 + $0x20] sm:$0xff]   ;;  %v555_v33 = vld [vmem:[%s787_s5 + $0x30] sm:$0xff]   ;;  %v556_v34 = vld [vmem:[%s787_s5 + $0x38] sm:$0xff]   ;;  %s402_s5 = sshll.u32 %s639_s24, 4  ;;  %s403_s5 = int_to_ptr.vmem [resolvable:$true] %s402_s5 }
  0x2f   :  { %v421_v35 = vld [vmem:[%s786_s4] ss:$0 sm:$0xff]  ;;  %s605_s4 = scalar_lea.vmem %s403_s5, 128  ;;  %p610_p3 = scmp.lt.s32.totalorder %s403_s5, %s403_s5 }
  0x30   :  { %v430_v43 = vld [vmem:[%s788_s6] ss:$0 sm:$0xff]  ;;  %p606_p2 = scmp.ne.s32.totalorder %s403_s5, %s605_s4  ;;  %p611_p4 = scmp.lt.s32.totalorder %s605_s4, %s605_s4 }
  0x31   :  { %471 = vmatpush3.bf16.msra.mxu0 %v535_v3  ;;  %491 = vmatpush3.bf16.msra.mxu1 %v543_v8 }
  0x32   :  { %472 = vmatprep.subr.bf16.mxu0 %v637_v0  ;;  %492 = vmatprep.subr.bf16.mxu1 %v637_v0  ;;  %p612_p5 = por %p611_p4, %p610_p3 }
  0x34   :  { %p613_p6 = pnand %p612_p5, %p606_p2 }
  0x35   :  { %473 = vmatpush3.bf16.msra.mxu0 %v536_v5  ;;  %493 = vmatpush3.bf16.msra.mxu1 %v544_v10 }
  0x36   :  { %474 = vmatprep.subr.bf16.mxu0 %v637_v0  ;;  %494 = vmatprep.subr.bf16.mxu1 %v637_v0 }
  0x39   :  { %475 = vmatpush3.bf16.msra.mxu0 %v537_v7  ;;  %495 = vmatpush3.bf16.msra.mxu1 %v545_v15 }
  0x3a   :  { %476 = vmatprep.subr.bf16.mxu0 %v637_v0  ;;  %496 = vmatprep.subr.bf16.mxu1 %v637_v0 }
  0x3d   :  { %477 = vmatpush3.bf16.msra.mxu0 %v538_v9  ;;  %497 = vmatpush3.bf16.msra.mxu1 %v546_v16 }
  0x3e   :  { %478 = vmatprep.subr.bf16.mxu0 %v637_v0  ;;  %498 = vmatprep.subr.bf16.mxu1 %v637_v0 }
  0x41   :  { %479 = vmatpush3.bf16.msra.mxu0 %v539_v11  ;;  %499 = vmatpush3.bf16.msra.mxu1 %v547_v17 }
  0x42   :  { %480 = vmatprep.subr.bf16.mxu0 %v637_v0  ;;  %500 = vmatprep.subr.bf16.mxu1 %v637_v0 }
  0x45   :  { %481 = vmatpush3.bf16.msra.mxu0 %v540_v12  ;;  %501 = vmatpush3.bf16.msra.mxu1 %v548_v18 }
  0x46   :  { %506 = vmatprep.subr.bf16.mxu0 %v637_v0 }
  0x48   :  { %483 = vmatmul.mubr.bf16.vlgmr.msra.gmra.mrb[0].mxu0 %v74_v14 }
  0x49   :  { %522 = vmatprep.mubr.msk.bf16.mxu0 %vm638_vm0, %v637_v0  ;;  %507 = vmatpush3.bf16.msra.mxu0 %v549_v19 }
  0x4a   :  { %508 = vmatprep.subr.bf16.mxu0 %v637_v0 }
  0x4d   :  { %509 = vmatpush3.bf16.msra.mxu0 %v550_v20 }
  0x4e   :  { %510 = vmatprep.subr.bf16.mxu0 %v637_v0 }
  0x51   :  { %511 = vmatpush3.bf16.msra.mxu0 %v551_v21 }
  0x52   :  { %512 = vmatprep.subr.bf16.mxu0 %v637_v0 }
  0x55   :  { %513 = vmatpush3.bf16.msra.mxu0 %v552_v22 }
  0x56   :  { %514 = vmatprep.subr.bf16.mxu0 %v637_v0 }
  0x59   :  { %515 = vmatpush3.bf16.msra.mxu0 %v553_v31 }
  0x5a   :  { %516 = vmatprep.subr.bf16.mxu0 %v637_v0 }
  0x5d   :  { %517 = vmatpush3.bf16.msra.mxu0 %v554_v32 }
  0x5e   :  { %518 = vmatprep.subr.bf16.mxu0 %v637_v0 }
  0x61   :  { %519 = vmatpush3.bf16.msra.mxu0 %v555_v33 }
  0x62   :  { %520 = vmatprep.subr.bf16.mxu0 %v637_v0 }
  0x65   :  { %521 = vmatpush3.bf16.msra.mxu0 %v556_v34 }
 0x11b   :  { %v163_v24 = vpop.f32.mrb[0].mxu0 }
 0x11c   :  { %v164_v25 = vadd.f32 %v412_v23, %v163_v24  ;;  %v484_v26 = vpop.f32.mrb[1].mxu0 }
 0x11d   :  { %v166_v27 = vpop.f32.mrb[2].mxu0 }
 0x11e   :  { %557 = vtanh.f32 %v164_v25  ;;  %v485_v28 = vpop.f32.mrb[3].mxu0 }
 0x128   :  { %v558_v29 = vpop.eup %557 }
 0x129   :  { %v187_v30 = vpack.c.bf16 %v558_v29, %v558_v29 }
 0x12b   :  { %503 = vmatmul.mubr.bf16.vlgmr.msra.gmra.mrb[0].mxu1 %v187_v30 }
 0x1fe   :  { %v276_v36 = vpop.f32.mrb[0].mxu1 }
 0x1ff   :  { %v277_v37 = vadd.f32 %v421_v35, %v276_v36  ;;  %v504_v38 = vpop.f32.mrb[1].mxu1 }
 0x200   :  { %v279_v39 = vpop.f32.mrb[2].mxu1 }
 0x201   :  { %559 = vtanh.f32 %v277_v37  ;;  %v505_v40 = vpop.f32.mrb[3].mxu1 }
 0x20b   :  { %v560_v41 = vpop.eup %559 }
 0x20c   :  { %v300_v42 = vpack.c.bf16 %v560_v41, %v560_v41 }
 0x20e   :  { %523 = vmatmul.mubr.bf16.vlgmr.msra.gmra.mrb[4].mxu0 %v300_v42 }
 0x2e1   :  { %v389_v44 = vpop.f32.mrb[4].mxu0 }
 0x2e2   :  { %v390_v45 = vadd.f32 %v430_v43, %v389_v44  ;;  %v524_v46 = vpop.f32.mrb[5].mxu0 }
 0x2e3   :  { %v392_v47 = vpop.f32.mrb[6].mxu0 }
 0x2e4   :  { %395 = vst [vmem:[#allocation7] sm:$0xff] %v390_v45  ;;  %v525_v48 = vpop.f32.mrb[7].mxu0 }
 0x2e5   :  { %616 = shalt.err (!%p613_p6)
}
 0x2e6   :  { %s617_s6 = scalar_lea.hbm %s789_s7, 128 }
 0x2e7   :  { %p618_p7 = scmp.ne.s32.totalorder %s789_s7, %s617_s6  ;;  %p621_p8 = scmp.lt.u32.totalorder %s617_s6, %s789_s7 }
 0x2e9   :  { %p623_p9 = pnand %p621_p8, %p618_p7 }
 0x2eb   :  { %626 = shalt.err (!%p623_p9)
}
 0x2ec   :  { %405 = dma.vmem_to_hbm [thread:$0]  %s403_s5, 128, %s789_s7, [#allocation4]  }
 0x2ed   :  { %631 = dma.done.wait [#allocation4], 128  }
 0x2ee   :  { %632 = vsyncadd [#allocation4], 4294967168 }
 0x2ef   :  { %409 = vsyncpa [#allocation3], 1 }
 0x2f0   :  { %410 = vsyncpa [#allocation6], 1 }
 0x2f1   :  { %411 = vsyncpa [#allocation4], 1 }

// kernel: forward.1
= control target key start
LH: loop header
LB: loop body
LE: loop exit
PB: predicated region body
PF: predicated region fallthrough
CT: control target
= control target key end

     0   :  { %12 = vsyncpa [#allocation3], 0  ;;  %s782_s0 = inlined_call_operand.vmem [shape: f32[8,128], index: 0, kind: input, shape index: {}]   ;;  %s783_s1 = inlined_call_operand.hbm [shape: bf16[128,128], index: 1, kind: input, shape index: {}]   ;;  %s784_s2 = inlined_call_operand.vmem [shape: f32[1,128], index: 2, kind: input, shape index: {}]   ;;  %s785_s3 = inlined_call_operand.hbm [shape: bf16[128,128], index: 3, kind: input, shape index: {}]   ;;  %s786_s4 = inlined_call_operand.vmem [shape: f32[1,128], index: 4, kind: input, shape index: {}]   ;;  %s787_s5 = inlined_call_operand.vmem [shape: bf16[128,128], index: 5, kind: input, shape index: {}]   ;;  %s788_s6 = inlined_call_operand.vmem [shape: f32[1,128], index: 6, kind: input, shape index: {}]   ;;  %s789_s7 = inlined_call_operand.hbm [shape: f32[8,128], index: 7, kind: output, shape index: {}]  }
   0x1   :  { %13 = vsyncpa [#allocation6], 0 }
   0x2   :  { %14 = vsyncpa [#allocation4], 0  ;;  %s633_s24 = smov [#allocation2]   ;;  %s561_s28 = scalar_lea.hbm %s783_s1, 1024 }
   0x3   :  { %s22_s25 = sshll.u32 %s633_s24, 4  ;;  %p562_p0 = scmp.ne.s32.totalorder %s783_s1, %s561_s28  ;;  %s23_s25 = int_to_ptr.vmem [resolvable:$true] %s22_s25 }
   0x4   :  { %p565_p1 = scmp.lt.u32.totalorder %s561_s28, %s783_s1 }
   0x6   :  { %p567_p2 = pnand %p565_p1, %p562_p0 }
   0x8   :  { %570 = shalt.err (!%p567_p2)
}
   0x9   :  { %s571_s10 = scalar_lea.vmem %s23_s25, 1024  ;;  %p576_p4 = scmp.lt.s32.totalorder %s23_s25, %s23_s25 }
   0xa   :  { %p572_p3 = scmp.ne.s32.totalorder %s23_s25, %s571_s10  ;;  %p577_p5 = scmp.lt.s32.totalorder %s571_s10, %s571_s10 }
   0xc   :  { %p578_p6 = por %p577_p5, %p576_p4 }
   0xe   :  { %p579_p7 = pnand %p578_p6, %p572_p3 }
  0x10   :  { %582 = shalt.err (!%p579_p7)
}
  0x11   :  { %s634_s11 = smov 64   ;;  %s635_s12 = smov 4  }
  0x12   :  { %28 = dma.hbm_to_vmem [thread:$0]  %s783_s1, 1024, %s23_s25, [#allocation3], %s634_s11, %s634_s11, %s635_s12  }
  0x13   :  { %s636_s15 = smov [#allocation5]   ;;  %s583_s19 = scalar_lea.hbm %s785_s3, 1024 }
  0x14   :  { %s36_s16 = sshll.u32 %s636_s15, 4  ;;  %p584_p8 = scmp.ne.s32.totalorder %s785_s3, %s583_s19  ;;  %s37_s16 = int_to_ptr.vmem [resolvable:$true] %s36_s16 }
  0x15   :  { %p587_p9 = scmp.lt.u32.totalorder %s583_s19, %s785_s3 }
  0x17   :  { %p589_p10 = pnand %p587_p9, %p584_p8 }
  0x19   :  { %592 = shalt.err (!%p589_p10)
}
  0x1a   :  { %s593_s24 = scalar_lea.vmem %s37_s16, 1024  ;;  %p598_p12 = scmp.lt.s32.totalorder %s37_s16, %s37_s16 }
  0x1b   :  { %p594_p11 = scmp.ne.s32.totalorder %s37_s16, %s593_s24  ;;  %p599_p13 = scmp.lt.s32.totalorder %s593_s24, %s593_s24 }
  0x1d   :  { %p600_p0 = por %p599_p13, %p598_p12 }
  0x1f   :  { %p601_p1 = pnand %p600_p0, %p594_p11 }
  0x21   :  { %604 = shalt.err (!%p601_p1)
}
  0x22   :  { %42 = dma.hbm_to_vmem [thread:$0]  %s785_s3, 1024, %s37_s16, [#allocation6], %s634_s11, %s634_s11, %s635_s12  }
  0x23   :  { %627 = dma.done.wait [#allocation3], 1024  }
  0x24   :  { %628 = vsyncadd [#allocation3], 4294966272 }
  0x25   :  { %629 = dma.done.wait [#allocation6], 1024  }
  0x26   :  { %630 = vsyncadd [#allocation6], 4294966272  ;;  %v637_v0 = vmov 0.0   ;;  %vm638_vm0 = vmmov 0   ;;  %v533_v1 = vld [vmem:[#allocation2] sm:$0xff]   ;;  %v534_v2 = vld [vmem:[#allocation2 + $0x8] sm:$0xff]  }
  0x27   :  { %466 = vmatprep.subr.bf16.mxu0 %v637_v0  ;;  %482 = vmatprep.mubr.msk.bf16.mxu0 %vm638_vm0, %v637_v0  ;;  %v535_v3 = vld [vmem:[#allocation2 + $0x10] sm:$0xff]   ;;  %v541_v4 = vld [vmem:[#allocation5] sm:$0xff]   ;;  %v536_v5 = vld [vmem:[#allocation2 + $0x18] sm:$0xff]   ;;  %s639_s24 = smov [#allocation7]  }
  0x28   :  { %486 = vmatprep.subr.bf16.mxu1 %v637_v0  ;;  %502 = vmatprep.mubr.msk.bf16.mxu1 %vm638_vm0, %v637_v0  ;;  %v542_v6 = vld [vmem:[#allocation5 + $0x8] sm:$0xff]   ;;  %v537_v7 = vld [vmem:[#allocation2 + $0x20] sm:$0xff]   ;;  %v543_v8 = vld [vmem:[#allocation5 + $0x10] sm:$0xff]  }
  0x29   :  { %467 = vmatpush3.bf16.msra.mxu0 %v533_v1  ;;  %487 = vmatpush3.bf16.msra.mxu1 %v541_v4  ;;  %v538_v9 = vld [vmem:[#allocation2 + $0x28] sm:$0xff]   ;;  %v544_v10 = vld [vmem:[#allocation5 + $0x18] sm:$0xff]   ;;  %v539_v11 = vld [vmem:[#allocation2 + $0x30] sm:$0xff]  }
  0x2a   :  { %468 = vmatprep.subr.bf16.mxu0 %v637_v0  ;;  %488 = vmatprep.subr.bf16.mxu1 %v637_v0  ;;  %v540_v12 = vld [vmem:[#allocation2 + $0x38] sm:$0xff]   ;;  %v56_v13 = vld [vmem:[%s782_s0] sm:$0xff]  ;;  %v546_v16 = vld [vmem:[#allocation5 + $0x28] sm:$0xff]  }
  0x2b   :  { %v74_v14 = vpack.c.bf16 %v56_v13, %v56_v13  ;;  %v545_v15 = vld [vmem:[#allocation5 + $0x20] sm:$0xff]   ;;  %v547_v17 = vld [vmem:[#allocation5 + $0x30] sm:$0xff]   ;;  %v548_v18 = vld [vmem:[#allocation5 + $0x38] sm:$0xff]  }
  0x2c   :  { %v549_v19 = vld [vmem:[%s787_s5] sm:$0xff]   ;;  %v550_v20 = vld [vmem:[%s787_s5 + $0x8] sm:$0xff]   ;;  %v551_v21 = vld [vmem:[%s787_s5 + $0x10] sm:$0xff]  }
  0x2d   :  { %469 = vmatpush3.bf16.msra.mxu0 %v534_v2  ;;  %489 = vmatpush3.bf16.msra.mxu1 %v542_v6  ;;  %v552_v22 = vld [vmem:[%s787_s5 + $0x18] sm:$0xff]   ;;  %v412_v23 = vld [vmem:[%s784_s2] ss:$0 sm:$0xff]  ;;  %v554_v32 = vld [vmem:[%s787_s5 + $0x28] sm:$0xff]  }
  0x2e   :  { %470 = vmatprep.subr.bf16.mxu0 %v637_v0  ;;  %490 = vmatprep.subr.bf16.mxu1 %v637_v0  ;;  %v553_v31 = vld [vmem:[%s787_s5 + $0x20] sm:$0xff]   ;;  %v555_v33 = vld [vmem:[%s787_s5 + $0x30] sm:$0xff]   ;;  %v556_v34 = vld [vmem:[%s787_s5 + $0x38] sm:$0xff]   ;;  %s402_s5 = sshll.u32 %s639_s24, 4  ;;  %s403_s5 = int_to_ptr.vmem [resolvable:$true] %s402_s5 }
  0x2f   :  { %v421_v35 = vld [vmem:[%s786_s4] ss:$0 sm:$0xff]  ;;  %s605_s4 = scalar_lea.vmem %s403_s5, 128  ;;  %p610_p3 = scmp.lt.s32.totalorder %s403_s5, %s403_s5 }
  0x30   :  { %v430_v43 = vld [vmem:[%s788_s6] ss:$0 sm:$0xff]  ;;  %p606_p2 = scmp.ne.s32.totalorder %s403_s5, %s605_s4  ;;  %p611_p4 = scmp.lt.s32.totalorder %s605_s4, %s605_s4 }
  0x31   :  { %471 = vmatpush3.bf16.msra.mxu0 %v535_v3  ;;  %491 = vmatpush3.bf16.msra.mxu1 %v543_v8 }
  0x32   :  { %472 = vmatprep.subr.bf16.mxu0 %v637_v0  ;;  %492 = vmatprep.subr.bf16.mxu1 %v637_v0  ;;  %p612_p5 = por %p611_p4, %p610_p3 }
  0x34   :  { %p613_p6 = pnand %p612_p5, %p606_p2 }
  0x35   :  { %473 = vmatpush3.bf16.msra.mxu0 %v536_v5  ;;  %493 = vmatpush3.bf16.msra.mxu1 %v544_v10 }
  0x36   :  { %474 = vmatprep.subr.bf16.mxu0 %v637_v0  ;;  %494 = vmatprep.subr.bf16.mxu1 %v637_v0 }
  0x39   :  { %475 = vmatpush3.bf16.msra.mxu0 %v537_v7  ;;  %495 = vmatpush3.bf16.msra.mxu1 %v545_v15 }
  0x3a   :  { %476 = vmatprep.subr.bf16.mxu0 %v637_v0  ;;  %496 = vmatprep.subr.bf16.mxu1 %v637_v0 }
  0x3d   :  { %477 = vmatpush3.bf16.msra.mxu0 %v538_v9  ;;  %497 = vmatpush3.bf16.msra.mxu1 %v546_v16 }
  0x3e   :  { %478 = vmatprep.subr.bf16.mxu0 %v637_v0  ;;  %498 = vmatprep.subr.bf16.mxu1 %v637_v0 }
  0x41   :  { %479 = vmatpush3.bf16.msra.mxu0 %v539_v11  ;;  %499 = vmatpush3.bf16.msra.mxu1 %v547_v17 }
  0x42   :  { %480 = vmatprep.subr.bf16.mxu0 %v637_v0  ;;  %500 = vmatprep.subr.bf16.mxu1 %v637_v0 }
  0x45   :  { %481 = vmatpush3.bf16.msra.mxu0 %v540_v12  ;;  %501 = vmatpush3.bf16.msra.mxu1 %v548_v18 }
  0x46   :  { %506 = vmatprep.subr.bf16.mxu0 %v637_v0 }
  0x48   :  { %483 = vmatmul.mubr.bf16.vlgmr.msra.gmra.mrb[0].mxu0 %v74_v14 }
  0x49   :  { %522 = vmatprep.mubr.msk.bf16.mxu0 %vm638_vm0, %v637_v0  ;;  %507 = vmatpush3.bf16.msra.mxu0 %v549_v19 }
  0x4a   :  { %508 = vmatprep.subr.bf16.mxu0 %v637_v0 }
  0x4d   :  { %509 = vmatpush3.bf16.msra.mxu0 %v550_v20 }
  0x4e   :  { %510 = vmatprep.subr.bf16.mxu0 %v637_v0 }
  0x51   :  { %511 = vmatpush3.bf16.msra.mxu0 %v551_v21 }
  0x52   :  { %512 = vmatprep.subr.bf16.mxu0 %v637_v0 }
  0x55   :  { %513 = vmatpush3.bf16.msra.mxu0 %v552_v22 }
  0x56   :  { %514 = vmatprep.subr.bf16.mxu0 %v637_v0 }
  0x59   :  { %515 = vmatpush3.bf16.msra.mxu0 %v553_v31 }
  0x5a   :  { %516 = vmatprep.subr.bf16.mxu0 %v637_v0 }
  0x5d   :  { %517 = vmatpush3.bf16.msra.mxu0 %v554_v32 }
  0x5e   :  { %518 = vmatprep.subr.bf16.mxu0 %v637_v0 }
  0x61   :  { %519 = vmatpush3.bf16.msra.mxu0 %v555_v33 }
  0x62   :  { %520 = vmatprep.subr.bf16.mxu0 %v637_v0 }
  0x65   :  { %521 = vmatpush3.bf16.msra.mxu0 %v556_v34 }
 0x11b   :  { %v163_v24 = vpop.f32.mrb[0].mxu0 }
 0x11c   :  { %v164_v25 = vadd.f32 %v412_v23, %v163_v24  ;;  %v484_v26 = vpop.f32.mrb[1].mxu0 }
 0x11d   :  { %v166_v27 = vpop.f32.mrb[2].mxu0 }
 0x11e   :  { %557 = vtanh.f32 %v164_v25  ;;  %v485_v28 = vpop.f32.mrb[3].mxu0 }
 0x128   :  { %v558_v29 = vpop.eup %557 }
 0x129   :  { %v187_v30 = vpack.c.bf16 %v558_v29, %v558_v29 }
 0x12b   :  { %503 = vmatmul.mubr.bf16.vlgmr.msra.gmra.mrb[0].mxu1 %v187_v30 }
 0x1fe   :  { %v276_v36 = vpop.f32.mrb[0].mxu1 }
 0x1ff   :  { %v277_v37 = vadd.f32 %v421_v35, %v276_v36  ;;  %v504_v38 = vpop.f32.mrb[1].mxu1 }
 0x200   :  { %v279_v39 = vpop.f32.mrb[2].mxu1 }
 0x201   :  { %559 = vtanh.f32 %v277_v37  ;;  %v505_v40 = vpop.f32.mrb[3].mxu1 }
 0x20b   :  { %v560_v41 = vpop.eup %559 }
 0x20c   :  { %v300_v42 = vpack.c.bf16 %v560_v41, %v560_v41 }
 0x20e   :  { %523 = vmatmul.mubr.bf16.vlgmr.msra.gmra.mrb[4].mxu0 %v300_v42 }
 0x2e1   :  { %v389_v44 = vpop.f32.mrb[4].mxu0 }
 0x2e2   :  { %v390_v45 = vadd.f32 %v430_v43, %v389_v44  ;;  %v524_v46 = vpop.f32.mrb[5].mxu0 }
 0x2e3   :  { %v392_v47 = vpop.f32.mrb[6].mxu0 }
 0x2e4   :  { %395 = vst [vmem:[#allocation7] sm:$0xff] %v390_v45  ;;  %v525_v48 = vpop.f32.mrb[7].mxu0 }
 0x2e5   :  { %616 = shalt.err (!%p613_p6)
}
 0x2e6   :  { %s617_s6 = scalar_lea.hbm %s789_s7, 128 }
 0x2e7   :  { %p618_p7 = scmp.ne.s32.totalorder %s789_s7, %s617_s6  ;;  %p621_p8 = scmp.lt.u32.totalorder %s617_s6, %s789_s7 }
 0x2e9   :  { %p623_p9 = pnand %p621_p8, %p618_p7 }
 0x2eb   :  { %626 = shalt.err (!%p623_p9)
}
 0x2ec   :  { %405 = dma.vmem_to_hbm [thread:$0]  %s403_s5, 128, %s789_s7, [#allocation4]  }
 0x2ed   :  { %631 = dma.done.wait [#allocation4], 128  }
 0x2ee   :  { %632 = vsyncadd [#allocation4], 4294967168 }
 0x2ef   :  { %409 = vsyncpa [#allocation3], 1 }
 0x2f0   :  { %410 = vsyncpa [#allocation6], 1 }
 0x2f1   :  { %411 = vsyncpa [#allocation4], 1 }

</bundles_post_ra>
